<compile_context>
chip_gen: v6e
topology: v6e:2x2x1
jax: 0.10.0
libtpu: 0.0.40
codegen_flags: <defaults>
</compile_context>

<pallas_src>
import functools

import jax
import jax.numpy as jnp
from jax import lax
from jax.experimental import pallas as pl
from jax.experimental.pallas import tpu as pltpu


# ---------------------------------------------------------------------------
# tiling helpers
# ---------------------------------------------------------------------------
_VMEM_BUDGET = 12 * 1024 * 1024        # stay under v5e's 16 MiB scoped default
_TARGET_BLOCK_BYTES = 2 * 1024 * 1024  # ~2 MiB of x per grid step
_MAX_NB = 16                           # bound the per-step unroll over images


def _round_up(a, b):
    return -(-a // b) * b


def _pick_channel_pack(C, gs, cap=128):
    """Largest multiple of gs that divides C, is a multiple of 8 and <= cap.

    A multiple-of-8 channel pack fills all 8 f32 sublanes and satisfies the
    (8, 128) block-shape constraint.  If no such pack exists the block's
    second-to-last dim must equal the full channel dim, so fall back to C.
    """
    best = None
    cb = gs
    while cb <= C:
        if C % cb == 0 and cb % 8 == 0 and cb <= max(cap, gs):
            best = cb
        cb += gs
    return best if best is not None else C


def _pick_lane_tile(HW, Cb, target_elems):
    """Lane tile: multiple of 128 (lane-dense, unmasked vst) capped by budget."""
    if HW <= 128:
        return HW                               # block == full lane dim
    cap = max(128, (target_elems // Cb) // 128 * 128)
    return min(_round_up(HW, 128), cap)


def _pick_batch_block(N, max_nb):
    """Largest divisor of N that is <= max_nb (and <= _MAX_NB)."""
    nb = 1
    for cand in range(1, min(N, _MAX_NB) + 1):
        if N % cand == 0 and cand <= max_nb:
            nb = cand
    return nb


# ---------------------------------------------------------------------------
# kernels
# ---------------------------------------------------------------------------
def _stats_kernel(x_ref, sum_ref, cross_ref, *, hw, mask_tail):
    # x_ref block: (Nb, Cb, Mt).  Outputs: per-(batch-block, pack) partial
    # channel sums (Cb, 1) and cross products (Cb, Cb), resident in VMEM
    # across the lane-tile reduction axis; mean / per-group covariance are
    # finalized in the glue.
    m = pl.program_id(2)

    @pl.when(m == 0)
    def _init():
        sum_ref[...] = jnp.zeros_like(sum_ref)
        cross_ref[...] = jnp.zeros_like(cross_ref)

    nb, cb, mt = x_ref.shape
    for i in range(nb):
        x = x_ref[i]                                       # (Cb, Mt), native dtype
        if mask_tail:
            # Partial last lane tile: zero the padded columns so they cannot
            # corrupt the sums (input padding of partial blocks is undefined).
            valid = hw - m * mt
            lane = lax.broadcasted_iota(jnp.int32, (cb, mt), 1)
            x = jnp.where(lane < valid, x, jnp.zeros_like(x))
        sum_ref[0, 0] += jnp.sum(x.astype(jnp.float32), axis=-1, keepdims=True)
        # Large contraction dim (Mt), tiny (Cb, Cb) output: rides the MXU slot
        # and hides under the HBM stream.  Native-dtype operands, f32 accum.
        cross_ref[0, 0] += lax.dot_general(
            x, x, dimension_numbers=(((1,), (1,)), ((), ())),
            preferred_element_type=jnp.float32)


def _apply_kernel(x_ref, w_ref, b_ref, out_ref):
    # out = W' @ x + shift, with W' block-diagonal over the whitening groups
    # inside the channel pack.  Centering and the affine are already folded
    # into W' / shift, so there is no per-element subtract or gamma multiply.
    nb, cb, _ = x_ref.shape
    b = b_ref[0]                                           # (Cb, 1) f32
    if cb >= 8:
        # MXU path: native-dtype operands (bf16 stays on the fast path), f32
        # accumulation.  The pass is HBM-bound, so the matmul hides under the
        # stream; this also keeps the VPU off the critical VLIW slot on v7x.
        w = w_ref[0]                                       # (Cb, Cb), x dtype
        for i in range(nb):
            y = jnp.dot(w, x_ref[i], preferred_element_type=jnp.float32) + b
            out_ref[i] = y.astype(out_ref.dtype)
    else:
        # Tiny channel packs (only reachable when C < 8): VPU broadcast-MACs.
        # TODO(synk): stride-0 broadcast loads + SMEM scalar w/b would remove
        # the per-column cross-lane/sublane broadcasts here.
        w = w_ref[0].astype(jnp.float32)
        for i in range(nb):
            x = x_ref[i].astype(jnp.float32)
            acc = jnp.broadcast_to(b, x.shape)
            for c in range(cb):
                acc = acc + w[:, c:c + 1] * x[c:c + 1, :]
            out_ref[i] = acc.astype(out_ref.dtype)


# ---------------------------------------------------------------------------
# wrapper (forward pass)
# ---------------------------------------------------------------------------
def whitening_scale_shift_forward(x, gamma, beta, group_size, eps=1e-5):
    """x: (N, C, H, W); gamma/beta: (C, 1, 1). Returns (N, C, H, W)."""
    N, C, H, W = x.shape
    gs = int(group_size)
    assert C % gs == 0, f"planes ({C}) must be divisible by group_size ({gs})"
    G = C // gs
    HW = H * W
    M = N * HW
    itemsize = x.dtype.itemsize

    # ---- block sizing against an explicit VMEM budget -----------------------
    Cb = _pick_channel_pack(C, gs)          # channels per kernel block
    P = C // Cb                             # channel packs
    Gb = Cb // gs                           # whitening groups per pack

    # Apply pass double-buffers both its x block and its out block, so
    # per-step VMEM ~ 4 * block_bytes (+ tiny w / shift blocks).
    target_elems = min(_VMEM_BUDGET // (4 * itemsize),
                       _TARGET_BLOCK_BYTES // itemsize)
    Mt = _pick_lane_tile(HW, Cb, target_elems)
    T = -(-HW // Mt)                        # cdiv: partial last tile allowed
    mask_tail = (T * Mt != HW)

    Nb = _pick_batch_block(N, max(1, target_elems // (Cb * Mt)))
    if P == 1 and N > 1:
        # Keep >= 2 blocks on the leading parallel axis so the stats pass can
        # shard across v7x's two TensorCores even with a single channel pack.
        Nb = min(Nb, max(1, N // 2))
        while N % Nb:
            Nb -= 1
    Nt = N // Nb

    # Free reshape: NCHW is already contiguous as (N, C, H*W).  No transpose.
    x3 = x.reshape(N, C, HW)
    bytes_x = x3.size * itemsize

    # ---- pass 1: per-channel sums & per-pack cross products ------------------
    stats_cost = pl.CostEstimate(
        flops=int(2 * C * Cb * M + 2 * C * M),
        transcendentals=0,
        bytes_accessed=int(bytes_x + Nt * P * (Cb + Cb * Cb) * 4))
    ch_sum, cross = pl.pallas_call(
        functools.partial(_stats_kernel, hw=HW, mask_tail=mask_tail),
        out_shape=(jax.ShapeDtypeStruct((Nt, P, Cb, 1), jnp.float32),
                   jax.ShapeDtypeStruct((Nt, P, Cb, Cb), jnp.float32)),
        grid_spec=pltpu.PrefetchScalarGridSpec(
            num_scalar_prefetch=0,
            grid=(Nt, P, T),                       # lane-tile reduction last
            in_specs=[pl.BlockSpec((Nb, Cb, Mt), lambda n, p, m: (n, p, m))],
            out_specs=(pl.BlockSpec((1, 1, Cb, 1), lambda n, p, m: (n, p, 0, 0)),
                       pl.BlockSpec((1, 1, Cb, Cb), lambda n, p, m: (n, p, 0, 0)))),
        compiler_params=pltpu.CompilerParams(
            dimension_semantics=("parallel", "parallel", "arbitrary")),
        cost_estimate=stats_cost,
    )(x3)

    # ---- tiny per-group linear algebra (glue) --------------------------------
    ch_sum = jnp.sum(ch_sum, axis=0)                            # (P, Cb, 1)
    cross = jnp.sum(cross, axis=0)                              # (P, Cb, Cb)
    mean = ch_sum / M
    cov_full = cross / M - mean * jnp.swapaxes(mean, -1, -2)    # (P, Cb, Cb)

    # Extract each group's (gs, gs) diagonal block of its pack's cross matrix.
    cov5 = cov_full.reshape(P, Gb, gs, Gb, gs)
    cov_g = jnp.diagonal(cov5, axis1=1, axis2=3)                # (P, gs, gs, Gb)
    cov_g = jnp.moveaxis(cov_g, -1, 1).reshape(G, gs, gs)
    mean_g = mean.reshape(G, gs, 1)

    # ZCA inverse square root of the (gs, gs) group covariances.
    # TODO(synk): eigendecomposition has no Pallas equivalent; done in JAX glue.
    eye = jnp.eye(gs, dtype=jnp.float32)
    evals, evecs = jnp.linalg.eigh(cov_g + eps * eye)           # (G,gs), (G,gs,gs)
    whiten = jnp.einsum('gij,gj,gkj->gik', evecs, 1.0 / jnp.sqrt(evals), evecs)

    # Fold affine + centering:  out = W' @ x + shift
    gamma_g = gamma.reshape(G, gs, 1).astype(jnp.float32)
    beta_g = beta.reshape(G, gs, 1).astype(jnp.float32)
    w_prime = gamma_g * whiten                                  # (G, gs, gs)
    shift = beta_g - jnp.einsum('gij,gjk->gik', w_prime, mean_g)  # (G, gs, 1)

    # Pack block-diagonally per channel pack: one (Cb, Cb) transform per block,
    # zero off-diagonal blocks => no cross-group mixing.
    eye_gb = jnp.eye(Gb, dtype=jnp.float32)
    w_packed = jnp.einsum('pgij,gh->pgihj',
                          w_prime.reshape(P, Gb, gs, gs),
                          eye_gb).reshape(P, Cb, Cb)
    w_packed = w_packed.astype(x.dtype)          # native-dtype MXU operand
    shift_packed = shift.reshape(P, Cb, 1)       # f32 (added post-accumulation)

    # ---- pass 2: whiten + affine (fully parallel grid) ------------------------
    apply_cost = pl.CostEstimate(
        flops=int(2 * C * Cb * M + C * M),
        transcendentals=0,
        bytes_accessed=int(2 * bytes_x))
    out3 = pl.pallas_call(
        _apply_kernel,
        out_shape=jax.ShapeDtypeStruct((N, C, HW), x.dtype),
        grid_spec=pltpu.PrefetchScalarGridSpec(
            num_scalar_prefetch=0,
            grid=(Nt, P, T),
            in_specs=[pl.BlockSpec((Nb, Cb, Mt), lambda n, p, m: (n, p, m)),
                      pl.BlockSpec((1, Cb, Cb), lambda n, p, m: (p, 0, 0)),
                      pl.BlockSpec((1, Cb, 1), lambda n, p, m: (p, 0, 0))],
            out_specs=pl.BlockSpec((Nb, Cb, Mt), lambda n, p, m: (n, p, m))),
        compiler_params=pltpu.CompilerParams(
            dimension_semantics=("parallel", "parallel", "parallel")),
        cost_estimate=apply_cost,
    )(x3, w_packed, shift_packed)

    # Free reshape back to NCHW.
    return out3.reshape(N, C, H, W)


# ---------------------------------------------------------------------------
# pure-JAX reference
# ---------------------------------------------------------------------------
def _reference(x, gamma, beta, group_size, eps=1e-5):
    N, C, H, W = x.shape
    gs = group_size
    G = C // gs
    M = N * H * W
    xg = jnp.transpose(x, (1, 0, 2, 3)).reshape(G, gs, M).astype(jnp.float32)
    mu = xg.mean(-1, keepdims=True)
    xc = xg - mu
    cov = jnp.einsum('gim,gjm->gij', xc, xc) / M
    s, u = jnp.linalg.eigh(cov + eps * jnp.eye(gs, dtype=jnp.float32))
    w = jnp.einsum('gij,gj,gkj->gik', u, 1.0 / jnp.sqrt(s), u)
    out = jnp.einsum('gij,gjm->gim', w, xc)
    out = out * gamma.reshape(G, gs, 1) + beta.reshape(G, gs, 1)
    return jnp.transpose(out.reshape(C, N, H, W), (1, 0, 2, 3))


if __name__ == "__main__":
    key = jax.random.PRNGKey(0)
    kx, kg, kb = jax.random.split(key, 3)
    N, C, H, W = 2, 4, 16, 16
    group_size = 2
    G = C // group_size

    # Non-zero mean exercises the folded centering; perturbed gamma/beta
    # (module init is ones/zeros) exercise the folded affine path.
    x = jax.random.normal(kx, (N, C, H, W), dtype=jnp.float32) + 0.5
    gamma = jnp.ones((C, 1, 1), jnp.float32) + 0.1 * jax.random.normal(kg, (C, 1, 1), jnp.float32)
    beta = 0.1 * jax.random.normal(kb, (C, 1, 1), jnp.float32)

    # Buffers matching the nn.Module __init__ (unused in training-mode forward).
    running_mean = jnp.zeros((G, group_size, 1), dtype=jnp.float32)
    running_variance = jnp.tile(jnp.eye(group_size, dtype=jnp.float32)[None], (G, 1, 1))

    out = whitening_scale_shift_forward(x, gamma, beta, group_size)
    out = jax.block_until_ready(out)

    ref = _reference(x, gamma, beta, group_size)
    err = float(jnp.max(jnp.abs(out - ref)))
    assert out.shape == (N, C, H, W)
    assert err < 2e-2, f"max abs error too large: {err}"
    print("KERNEL_OK")
</pallas_src>

<mosaic_0001>
module attributes {stable_mosaic.version = 11 : i64} {
  func.func @_stats_kernel(%arg0: i32, %arg1: i32, %arg2: i32, %arg3: memref<1x4x256xf32, #tpu.memory_space<vmem>>, %arg4: memref<1x1x4x1xf32, #tpu.memory_space<vmem>>, %arg5: memref<1x1x4x4xf32, #tpu.memory_space<vmem>>) attributes {dimension_semantics = [#tpu.dimension_semantics<parallel>, #tpu.dimension_semantics<parallel>, #tpu.dimension_semantics<arbitrary>], iteration_bounds = array<i64: 2, 1, 1>, scalar_prefetch = 0 : i64, scratch_operands = 0 : i64, tpu.core_type = #tpu.core_type<tc>, window_params = [{transform_indices = @transform_0, window_bounds = array<i64: 1, 4, 256>}, {transform_indices = @transform_1, window_bounds = array<i64: 1, 1, 4, 1>}, {transform_indices = @transform_2, window_bounds = array<i64: 1, 1, 4, 4>}]} {
    %c0_i32 = arith.constant 0 : i32
    %0 = arith.cmpi eq, %arg2, %c0_i32 : i32
    %1 = arith.extui %0 : i1 to i32
    %c0_i32_0 = arith.constant 0 : i32
    %2 = arith.cmpi ne, %1, %c0_i32_0 : i32
    scf.if %2 {
      %cst_20 = arith.constant 0.000000e+00 : f32
      %20 = vector.broadcast %cst_20 : f32 to vector<1x1x4x1xf32>
      %c0_21 = arith.constant 0 : index
      %c0_22 = arith.constant 0 : index
      %c0_23 = arith.constant 0 : index
      %c0_24 = arith.constant 0 : index
      %21 = vector.load %arg4[%c0_21, %c0_22, %c0_23, %c0_24] : memref<1x1x4x1xf32, #tpu.memory_space<vmem>>, vector<1x1x4x1xf32>
      tpu.vector_store %arg4[%c0_21, %c0_22, %c0_23, %c0_24], %20 {strides = array<i32>} : memref<1x1x4x1xf32, #tpu.memory_space<vmem>>, vector<1x1x4x1xf32>,
      %cst_25 = arith.constant 0.000000e+00 : f32
      %22 = vector.broadcast %cst_25 : f32 to vector<1x1x4x4xf32>
      %c0_26 = arith.constant 0 : index
      %c0_27 = arith.constant 0 : index
      %c0_28 = arith.constant 0 : index
      %c0_29 = arith.constant 0 : index
      %23 = vector.load %arg5[%c0_26, %c0_27, %c0_28, %c0_29] : memref<1x1x4x4xf32, #tpu.memory_space<vmem>>, vector<1x1x4x4xf32>
      tpu.vector_store %arg5[%c0_26, %c0_27, %c0_28, %c0_29], %22 {strides = array<i32>} : memref<1x1x4x4xf32, #tpu.memory_space<vmem>>, vector<1x1x4x4xf32>,
    } else {
    }
    %c0 = arith.constant 0 : index
    %c0_1 = arith.constant 0 : index
    %c0_2 = arith.constant 0 : index
    %3 = vector.load %arg3[%c0, %c0_1, %c0_2] : memref<1x4x256xf32, #tpu.memory_space<vmem>>, vector<1x4x256xf32>
    %4 = vector.shape_cast %3 : vector<1x4x256xf32> to vector<4x256xf32>
    %c0_3 = arith.constant 0 : index
    %c0_4 = arith.constant 0 : index
    %c0_5 = arith.constant 0 : index
    %c0_6 = arith.constant 0 : index
    %5 = vector.load %arg4[%c0_3, %c0_4, %c0_5, %c0_6] : memref<1x1x4x1xf32, #tpu.memory_space<vmem>>, vector<1x1x4x1xf32>
    %6 = vector.shape_cast %5 : vector<1x1x4x1xf32> to vector<4x1xf32>
    %cst = arith.constant dense<0.000000e+00> : vector<4xf32>
    %7 = vector.multi_reduction <add>, %4, %cst [1] : vector<4x256xf32> to vector<4xf32>
    %8 = vector.shape_cast %7 : vector<4xf32> to vector<4x1xf32>
    %9 = arith.addf %6, %8 : vector<4x1xf32>
    %c0_7 = arith.constant 0 : index
    %c0_8 = arith.constant 0 : index
    %c0_9 = arith.constant 0 : index
    %c0_10 = arith.constant 0 : index
    %10 = vector.load %arg4[%c0_7, %c0_8, %c0_9, %c0_10] : memref<1x1x4x1xf32, #tpu.memory_space<vmem>>, vector<1x1x4x1xf32>
    %11 = vector.shape_cast %10 : vector<1x1x4x1xf32> to vector<4x1xf32>
    %12 = vector.shape_cast %9 : vector<4x1xf32> to vector<1x1x4x1xf32>
    tpu.vector_store %arg4[%c0_7, %c0_8, %c0_9, %c0_10], %12 {strides = array<i32>} : memref<1x1x4x1xf32, #tpu.memory_space<vmem>>, vector<1x1x4x1xf32>,
    %c0_11 = arith.constant 0 : index
    %c0_12 = arith.constant 0 : index
    %c0_13 = arith.constant 0 : index
    %c0_14 = arith.constant 0 : index
    %13 = vector.load %arg5[%c0_11, %c0_12, %c0_13, %c0_14] : memref<1x1x4x4xf32, #tpu.memory_space<vmem>>, vector<1x1x4x4xf32>
    %14 = vector.shape_cast %13 : vector<1x1x4x4xf32> to vector<4x4xf32>
    %cst_15 = arith.constant dense<0.000000e+00> : vector<4x4xf32>
    %15 = tpu.matmul %4, %4, %cst_15 {dimension_numbers = #tpu.dot_dimension_numbers<[1], [1], [0], [0], [0, 0, 1, 0], [], []>} : vector<4x256xf32>, vector<4x256xf32>, vector<4x4xf32> -> vector<4x4xf32>
    %16 = arith.addf %14, %15 : vector<4x4xf32>
    %c0_16 = arith.constant 0 : index
    %c0_17 = arith.constant 0 : index
    %c0_18 = arith.constant 0 : index
    %c0_19 = arith.constant 0 : index
    %17 = vector.load %arg5[%c0_16, %c0_17, %c0_18, %c0_19] : memref<1x1x4x4xf32, #tpu.memory_space<vmem>>, vector<1x1x4x4xf32>
    %18 = vector.shape_cast %17 : vector<1x1x4x4xf32> to vector<4x4xf32>
    %19 = vector.shape_cast %16 : vector<4x4xf32> to vector<1x1x4x4xf32>
    tpu.vector_store %arg5[%c0_16, %c0_17, %c0_18, %c0_19], %19 {strides = array<i32>} : memref<1x1x4x4xf32, #tpu.memory_space<vmem>>, vector<1x1x4x4xf32>,
    return
  }
  func.func @transform_0(%arg0: i32, %arg1: i32, %arg2: i32) -> (i32, i32, i32) {
    %c0_i32 = arith.constant 0 : i32
    return %arg0, %arg1, %arg2 : i32, i32, i32
  }
  func.func @transform_1(%arg0: i32, %arg1: i32, %arg2: i32) -> (i32, i32, i32, i32) {
    %c0_i32 = arith.constant 0 : i32
    %c0_i32_0 = arith.constant 0 : i32
    %c0_i32_1 = arith.constant 0 : i32
    return %arg0, %arg1, %c0_i32, %c0_i32_0 : i32, i32, i32, i32
  }
  func.func @transform_2(%arg0: i32, %arg1: i32, %arg2: i32) -> (i32, i32, i32, i32) {
    %c0_i32 = arith.constant 0 : i32
    %c0_i32_0 = arith.constant 0 : i32
    %c0_i32_1 = arith.constant 0 : i32
    return %arg0, %arg1, %c0_i32, %c0_i32_0 : i32, i32, i32, i32
  }
}

</mosaic_0001>

<bundles_post_ra>
// kernel: tpu_custom_call.1
= control target key start
LH: loop header
LB: loop body
LE: loop exit
PB: predicated region body
PF: predicated region fallthrough
CT: control target
= control target key end

     0   :  { %8 = vsyncpa [#allocation3], 0  ;;  %s810_s0 = inlined_call_operand.hbm [shape: f32[2,4,256], index: 0, kind: input, shape index: {}]   ;;  %s811_s1 = inlined_call_operand.vmem [shape: f32[2,1,4,1], index: 1, kind: output, shape index: {0}]   ;;  %s812_s2 = inlined_call_operand.hbm [shape: f32[2,1,4,4], index: 2, kind: output, shape index: {1}]  }
   0x1   :  { %10 = vsyncpa [#allocation3 + $0x1], 0 }
   0x2   :  { %11 = vsyncpa [#allocation4], 0 }
   0x3   :  { %13 = vsyncpa [#allocation4 + $0x1], 0  ;;  %s656_s9 = smov 0   ;;  %s658_s10 = smov 0  }
   0x4   :  { %s660_s11 = smov 0   ;;  %s662_s12 = smov 0  }
   0x5   :  { %s664_s13 = smov 0   ;;  %s666_s14 = smov 0  }
   0x6 LB: > { %s448_s15 = sadd.s32 4294967295, %s636_s14   ;;  %s449_s16 = sadd.s32 4294967294, %s636_s14   ;;  %s636_s14 = sphi %s666_s14, %s19_s14   ;;  %s632_s13 = sphi %s664_s13, %s824_s13   ;;  %s628_s12 = sphi %s662_s12, %s823_s12   ;;  %s624_s11 = sphi %s660_s11, %s822_s11   ;;  %s620_s10 = sphi %s658_s10, %s821_s10   ;;  %s616_s9 = sphi %s656_s9, %s820_s9  }
   0x7   : > { %s38_s17 = sadd.s32 1, %s632_s13  ;;  %s49_s18 = sadd.s32 1, %s624_s11 }
   0x8   : > { %p40_p0 = scmp.ge.s32.totalorder %s38_s17, 2  ;;  %p56_p1 = scmp.ne.s32.totalorder %s624_s11, %s620_s10 }
   0x9   : > { %p57_p2 = scmp.eq.s32.totalorder %s636_s14, 0  ;;  %p62_p3 = scmp.ne.s32.totalorder %s620_s10, %s616_s9 }
   0xa   : > { %s826_s17 = smov (%p40_p0, %s38_s17), 0  ;;  %p63_p5 = scmp.eq.s32.totalorder %s448_s15, 0 }
   0xb   : > { %p697_p4 = por %p57_p2, %p56_p1  ;;  %s42_s20 = ssub.s32 %s632_s13, %s826_s17 }
   0xc   : > { %p116_p6 = scmp.eq.s32.totalorder %s448_s15, 1  ;;  %p47_p7 = scmp.eq.s32.totalorder %s42_s20, 0 }
   0xd   : > { %p703_p8 = por %p63_p5, %p62_p3  ;;  %p122_p10 = scmp.eq.s32.totalorder %s449_s16, 1 }
   0xe   : > { %p707_p9 = por %p116_p6, %p56_p1  ;;  %p476_p13 = scmp.lt.s32.totalorder %s636_s14, 2 }
   0xf   : > { %s712_s23 = scalar_select %p47_p7, %s624_s11, %s49_s18  }
  0x10   : > { %p714_p11 = por %p122_p10, %p62_p3  ;;  %s142_s25 = sand.u32 1, %s624_s11  }
  0x11   : > { %s452_s26 = sshll.u32 %s142_s25, 3  ;;  %s463_s27 = sshll.u32 %s632_s13, 7 }
  0x12   : > { %s816_s24 = scalar_select %p714_p11, 1, 0 }
  0x13   : > { %s156_s30 = scalar_lea.hbm %s810_s0, %s463_s27  ;;  %s146_s3 = scalar_lea.vmem [#allocation2], %s452_s26 }
  0x14   : > { %s158_s4 = sshll.u32 %s146_s3, 4  ;;  %p727_p0 = pnand %p476_p13, %p697_p4  ;;  %s159_s4 = int_to_ptr.vmem [resolvable:$true] %s158_s4 }
  0x15   : > { %p455_p1 = scmp.ge.s32.totalorder %s636_s14, 1  ;;  %p163_p2 = scmp.lt.s32.totalorder %s636_s14, 3 }
  0x16   : > { %s143_s6 = scalar_lea.sflag [#allocation3], %s142_s25  ;;  %p530_p3 = pneg %p727_p0 }
  0x17   : > { %s541_s7 = scalar_lea.vmem %s159_s4, 128  ;;  %s638_s8 = smov [#allocation2]  }
  0x18   : > { %p542_p5 = scmp.ne.s32.totalorder %s159_s4, %s541_s7  ;;  %s546_s15 = sshll.u32 %s638_s8, 4  ;;  %s547_s15 = int_to_ptr.vmem [resolvable:$false] %s546_s15 }
  0x19   : > { %s548_s16 = scalar_lea.vmem %s547_s15, 256  ;;  %p549_p10 = scmp.lt.s32.totalorder %s159_s4, %s547_s15 }
  0x1a   : > { %p544_p6 = pnand %p542_p5, %p530_p3  ;;  %p550_p12 = scmp.lt.s32.totalorder %s548_s16, %s541_s7 }
  0x1c   : > { %p545_p7 = pneg %p544_p6  ;;  %p551_p4 = por %p550_p12, %p549_p10 }
  0x1e   : > { %p552_p13 = pnand %p551_p4, %p545_p7 }
  0x20   : > { %555 = shalt.err (!%p552_p13)
}
  0x21   : > { %471 = dma.hbm_to_vmem [thread:$0]  (!%p727_p0), %s156_s30, 128, %s159_s4, %s143_s6  }
  0x22   : > { %p164_p11 = pnand %p455_p1, %p163_p2 }
  0x23   : > { %s742_s18 = sand.u32 (!%p164_p11), 1, %s620_s10  }
  0x24   : > { %167 = sbr.rel (%p164_p11) target bundleno = 257 (0x101), region = 24  ;;  %s456_s19 = sshll.u32 (!%p164_p11), %s742_s18, 3 }
  0x25   : > { %s170_s20 = scalar_lea.sflag (!%p164_p11), [#allocation3], %s742_s18  ;;  %s173_s25 = scalar_lea.vmem (!%p164_p11), [#allocation2], %s456_s19 }
  0x29   : > { %607 = dma.done.wait (%p703_p8), %s170_s20, 128  }
  0x2a   : > { %609 = vsyncadd (%p703_p8), %s170_s20, 4294967168  ;;  %s457_s26 = sshll.u32 %s742_s18, 2  ;;  %vm215_vm0 = vcmask 27648   ;;  %v639_v0 = vmov 0.0   ;;  %vm222_vm1 = vcmask 1043456   ;;  %v217_v1 = vld [vmem:[%s173_s25] sm:$0xff] }
  0x2b   : > { %s751_s27 = scalar_lea.vmem [#allocation5], %s457_s26  ;;  %v220_v2 = vcombine.high %v217_v1, %v217_v1  ;;  %v223_v3 = vsel %vm222_vm1, %v217_v1, 0.0  ;;  %p202_p8 = scmp.lt.s32.totalorder %s628_s12, 1  ;;  %vm213_vm2 = vcmask 3072  }
  0x2c   : > { %216 = vst.msk [vmem:[%s751_s27] sm:$0xf] %vm215_vm0, %v639_v0  ;;  %s460_s4 = sshll.u32 %s628_s12, 6  ;;  %s330_s5 = sshll.u32 %s751_s27, 4  ;;  %s331_s5 = int_to_ptr.vmem [resolvable:$true] %s330_s5 }
  0x2d   : > { %262 = vmatprep.subr.mxu0 %v220_v2  ;;  %296 = vmatprep.mubr.f32.mxu0 %v220_v2  ;;  %v224_v4 = vsel %vm222_vm1, %v220_v2, 0.0  ;;  %s203_s21 = scalar_select %p202_p8, %s628_s12, 1 }
  0x2e   : > { %263 = vmatpush1.xpose.msra.mxu0 %v217_v1  ;;  %v225_v5 = vadd.f32 %v224_v4, %v223_v3  ;;  %s766_s8 = scalar_lea.hbm %s812_s2, %s460_s4  ;;  %s313_s15 = scalar_lea.sflag [#allocation4], %s742_s18 }
  0x2f   : > { %s458_s28 = sshll.u32 %s203_s21, 2  ;;  %s556_s16 = scalar_lea.vmem %s331_s5, 64 }
  0x30   : > { %226 = vadd.xlane.f32.xlu0 %v225_v5  ;;  %s208_s3 = scalar_lea.vmem %s811_s1, %s458_s28  ;;  %p557_p11 = scmp.ne.s32.totalorder %s331_s5, %s556_s16 }
  0x31   : > { %297 = vmatmul.mubr.f32.vlgmr.msra.gmra.mxu0 %v217_v1  ;;  %214 = vst.msk [vmem:[%s208_s3] sm:$0xf] %vm213_vm2, %v639_v0  ;;  %s640_s19 = smov [#allocation5]  }
  0x32   : > { %p558_p12 = pnand %p557_p11, %p707_p9  ;;  %s560_s12 = sshll.u32 %s640_s19, 4  ;;  %s561_s12 = int_to_ptr.vmem [resolvable:$false] %s560_s12 }
  0x33   : > { %v231_v9 = vld [vmem:[%s751_s27] sm:$0xf]  ;;  %s562_s20 = scalar_lea.vmem %s561_s12, 128  ;;  %p563_p1 = scmp.lt.s32.totalorder %s331_s5, %s561_s12 }
  0x34   : > { %p559_p0 = pneg %p558_p12  ;;  %p564_p2 = scmp.lt.s32.totalorder %s562_s20, %s556_s16 }
  0x36   : > { %p565_p3 = por %p564_p2, %p563_p1 }
  0x38   : > { %v218_v6 = vld [vmem:[%s208_s3] sm:$0xf]  ;;  %p566_p5 = pnand %p565_p3, %p559_p0 }
  0xb9   : > { %v227_v7 = vpop.xlane.xlu0 %226 }
  0xba   : > { %v228_v8 = vadd.f32 %v227_v7, %v218_v6 }
  0xbc   : > { %230 = vst.msk [vmem:[%s208_s3] sm:$0xf] %vm213_vm2, %v228_v8 }
  0xf1   : > { %v298_v10 = vpop.f32.mrf.mxu0 }
  0xf2   : > { %v302_v11 = vadd.f32 %v298_v10, %v231_v9 }
  0xf3   : > { %v300_v12 = vpop.f32.mrf.mxu0 }
  0xf4   : > { %304 = vst.msk [vmem:[%s751_s27] sm:$0xf] %vm215_vm0, %v302_v11 }
  0xf5   : > { %569 = shalt.err (!%p566_p5)
}
  0xf6   : > { %s570_s25 = scalar_lea.hbm %s766_s8, 64  ;;  %s574_s27 = scalar_lea.hbm %s812_s2, 128 }
  0xf7   : > { %p571_p6 = scmp.ne.s32.totalorder %s766_s8, %s570_s25  ;;  %p575_p4 = scmp.lt.s32.totalorder %s766_s8, %s812_s2 }
  0xf8   : > { %p576_p13 = scmp.lt.s32.totalorder %s574_s27, %s570_s25 }
  0xf9   : > { %p572_p7 = pnand %p571_p6, %p707_p9 }
  0xfa   : > { %p577_p8 = por %p576_p13, %p575_p4 }
  0xfb   : > { %p573_p10 = pneg %p572_p7 }
  0xfd   : > { %p578_p11 = pnand %p577_p8, %p573_p10 }
  0xff   : > { %581 = shalt.err (!%p578_p11)
}
 0x100   : > { %466 = dma.vmem_to_hbm [thread:$0]  (%p707_p9), %s331_s5, 64, %s766_s8, %s313_s15  }
 0x101 PF: > { %s352_s29 = sand.u32 1, %s616_s9   ;;  %p818_p12 = scmp.ne.s32.totalorder %s816_s24, 0 }
 0x102   : > { %p819_p0 = scmp.ge.s32.totalorder %s636_s14, 2  ;;  %s353_s30 = scalar_lea.sflag [#allocation4], %s352_s29 }
 0x104   : > { %p473_p1 = pnand %p819_p0, %p818_p12 }
 0x106   : > { %p474_p2 = pneg %p473_p1 }
 0x108   : > { %611 = dma.done.wait (%p474_p2), %s353_s30, 64  }
 0x109   : > { %613 = vsyncadd (%p474_p2), %s353_s30, 4294967232  ;;  %s19_s14 = sadd.s32 1, %s636_s14   ;;  %s820_s9 = smov %s620_s10 }
 0x10a   : > { %p16_p3 = scmp.ge.s32.totalorder %s19_s14, 4   ;;  %s821_s10 = smov %s624_s11 }
 0x10b   : > { %s822_s11 = smov %s712_s23  ;;  %s823_s12 = smov %s632_s13 }
 0x10c   : > { %s824_s13 = smov %s826_s17  ;;  %18 = sbr.rel (!%p16_p3) target bundleno = 6 (0x6), region = 85 }
 0x111   :  { %358 = vsyncpa [#allocation3], 1 }
 0x112   :  { %360 = vsyncpa [#allocation3 + $0x1], 1 }
 0x113   :  { %361 = vsyncpa [#allocation4], 1 }
 0x114   :  { %363 = vsyncpa [#allocation4 + $0x1], 1 }

</bundles_post_ra>
